<compile_context>
chip_gen: v5e
topology: v5e:2x2
jax: 0.10.0
libtpu: 0.0.40
codegen_flags: <defaults>
</compile_context>

<pallas_src>
import functools

import jax
import jax.numpy as jnp
from jax.experimental import pallas as pl
from jax.experimental.pallas import tpu as pltpu

HIDDEN = 32
LANES = 128
OUT_LANES = 8  # packed output lanes: lane0=sin(angle), lane1=fric*cos(angle)

# Row layout of the packed weight slab (all blocks zero-padded to 128 lanes).
_W1_ROW, _W2_ROW, _W3_ROW, _WH_ROW = 0, 128, 256, 384
_B1_ROW, _B2_ROW, _B3_ROW, _BH_ROW, _SCALE_ROW = 512, 513, 514, 515, 516
_SLAB_ROWS = 520  # 4 * 128 weight blocks + one 8-row bias/scale block


def _round_up(x, m):
    return ((x + m - 1) // m) * m


def _swish(x):
    # x * sigmoid(x); sigmoid goes to the (otherwise idle) EUP slot.
    return x * jax.nn.sigmoid(x)


def _textdecoder_kernel(z_ref, w_ref, out_ref):
    """z_ref: (tb, nl_pad) latents.  w_ref: (520, 128) packed weights.
    out_ref: (tb, 8): lane0=sin(angle), lane1=friction*cos(angle)."""
    z = z_ref[...]
    nl = z_ref.shape[1]  # static: padded latent width (multiple of 8)

    def layer(x, w_row, b_row, k_rows=LANES):
        w = w_ref[pl.ds(w_row, k_rows), :]   # tile-aligned static slice
        b = w_ref[pl.ds(b_row, 1), :]        # (1, 128) bias row
        return jnp.dot(x, w, preferred_element_type=jnp.float32) + b

    h = _swish(layer(z, _W1_ROW, _B1_ROW, nl))   # contract only the real latent rows
    h = _swish(layer(h, _W2_ROW, _B2_ROW))
    h = _swish(layer(h, _W3_ROW, _B3_ROW))
    # Fused head: lane0 = angle, lane1 = angle + pi/2 (so sin -> cos),
    # lane2 = block_v (computed-but-unused in PyTorch; masked by scale=0).
    head = layer(h, _WH_ROW, _BH_ROW)

    scale = w_ref[pl.ds(_SCALE_ROW, 1), :]   # lane0=1.0, lane1=friction_coeff, rest 0
    out = jnp.sin(head) * scale              # single transcendental pass, no selects
    out_ref[...] = out[:, :OUT_LANES]        # narrow (tb, 8) store -> 16x less writeback


def pack_params(p, n_latents):
    """Pack all TextDecoder parameters into one (520, 128) f32 slab."""
    w1 = jnp.zeros((LANES, LANES), jnp.float32).at[:n_latents, :HIDDEN].set(p["w1"])
    w2 = jnp.zeros((LANES, LANES), jnp.float32).at[:HIDDEN, :HIDDEN].set(p["w2"])
    w3 = jnp.zeros((LANES, LANES), jnp.float32).at[:HIDDEN, :HIDDEN].set(p["w3"])
    wh = jnp.zeros((LANES, LANES), jnp.float32)
    wh = wh.at[:HIDDEN, 0].set(p["w_angle"][:, 0])
    wh = wh.at[:HIDDEN, 1].set(p["w_angle"][:, 0])    # duplicate angle into lane 1
    wh = wh.at[:HIDDEN, 2].set(p["w_blockv"][:, 0])   # block_v (unused by output)
    tail = jnp.zeros((8, LANES), jnp.float32)
    tail = tail.at[0, :HIDDEN].set(p["b1"])
    tail = tail.at[1, :HIDDEN].set(p["b2"])
    tail = tail.at[2, :HIDDEN].set(p["b3"])
    tail = tail.at[3, 0].set(p["b_angle"][0])
    tail = tail.at[3, 1].set(p["b_angle"][0] + jnp.pi / 2)  # sin(x+pi/2) == cos(x)
    tail = tail.at[3, 2].set(p["b_blockv"][0])
    tail = tail.at[4, 0].set(1.0)                          # scale for sin lane
    tail = tail.at[4, 1].set(p["friction_coeff"][0, 0])    # scale for cos lane
    return jnp.concatenate([w1, w2, w3, wh, tail], axis=0)  # (520, 128)


@functools.partial(jax.jit, static_argnames=("block_b",))
def textdecoder_forward(z, w_slab, *, block_b=2048):
    """z: (B, n_latents) f32; w_slab: pack_params(...) output.
    Returns label (B, 2) = [sin(angle), friction_coeff * cos(angle)]."""
    B, n_latents = z.shape
    nl_pad = _round_up(n_latents, 8)
    # Batch tile: big enough to amortize per-step overhead, but capped at
    # ceil(B/2) so there are always >= 2 "parallel" steps for v7x megacore.
    tb = min(block_b, max(8, _round_up(pl.cdiv(B, 2), 8)))
    b_pad = _round_up(B, tb)
    if b_pad == B and nl_pad == n_latents:
        z_p = z.astype(jnp.float32)
    else:
        z_p = jnp.zeros((b_pad, nl_pad), jnp.float32).at[:B, :n_latents].set(z)

    grid_spec = pltpu.PrefetchScalarGridSpec(
        num_scalar_prefetch=0,
        grid=(b_pad // tb,),
        in_specs=[
            pl.BlockSpec((tb, nl_pad), lambda i: (i, 0)),          # z tile, pipelined
            pl.BlockSpec((_SLAB_ROWS, LANES), lambda i: (0, 0)),   # weights, VMEM-resident
        ],
        out_specs=pl.BlockSpec((tb, OUT_LANES), lambda i: (i, 0)),
    )
    out = pl.pallas_call(
        _textdecoder_kernel,
        out_shape=jax.ShapeDtypeStruct((b_pad, OUT_LANES), jnp.float32),
        grid_spec=grid_spec,
        compiler_params=pltpu.CompilerParams(
            dimension_semantics=("parallel",),     # megacore sharding on v7x
            vmem_limit_bytes=32 * 1024 * 1024,     # safe on v5e/v6e/v7x; working set ~2 MiB
        ),
    )(z_p, w_slab)
    return out[:B, :2]


def init_params(key, n_latents, hidden=HIDDEN):
    """Deterministic synthetic init mirroring the PyTorch module's parameters."""
    keys = jax.random.split(key, 8)

    def lin(kw, in_f, out_f):
        w = 0.1 * jax.random.normal(kw, (in_f, out_f), jnp.float32)
        b = jnp.zeros((out_f,), jnp.float32)
        return w, b

    p = {}
    p["w1"], p["b1"] = lin(keys[0], n_latents, hidden)
    p["w2"], p["b2"] = lin(keys[1], hidden, hidden)
    p["w3"], p["b3"] = lin(keys[2], hidden, hidden)
    p["w_angle"], p["b_angle"] = lin(keys[3], hidden, 1)
    p["w_blockv"], p["b_blockv"] = lin(keys[4], hidden, 1)
    p["friction_coeff"] = jnp.full((1, 1), 5.0, jnp.float32)  # torch.ones(1,1)*5.0
    return p


def _reference_forward(z, p):
    """Pure-JAX reference mirroring the PyTorch TextDecoder.forward."""
    def swish(x):
        return x * jax.nn.sigmoid(x)

    h = swish(z @ p["w1"] + p["b1"])
    h = swish(h @ p["w2"] + p["b2"])
    h = swish(h @ p["w3"] + p["b3"])
    angle = h @ p["w_angle"] + p["b_angle"]          # (B, 1)
    _block_v = h @ p["w_blockv"] + p["b_blockv"]     # computed but unused (dead code)
    gravity_p = jnp.sin(angle)
    friction = p["friction_coeff"] * jnp.cos(angle)  # (B, 1)
    return jnp.concatenate([gravity_p, friction], axis=-1)  # (B, 2)


if __name__ == "__main__":
    n_latents = 8
    batch = 8

    key = jax.random.PRNGKey(0)
    kz, kp, kz2 = jax.random.split(key, 3)
    params = init_params(kp, n_latents)
    w_slab = pack_params(params, n_latents)

    # Small batch (single grid step).
    z = jax.random.normal(kz, (batch, n_latents), jnp.float32)
    label = textdecoder_forward(z, w_slab)
    jax.block_until_ready(label)
    label_ref = _reference_forward(z, params)
    assert label.shape == (batch, 2), f"bad shape {label.shape}"
    assert jnp.allclose(label, label_ref, atol=1e-4), "label mismatch (small batch)"

    # Larger batch exercising the multi-step grid + padding path (2 parallel steps).
    z_big = jax.random.normal(kz2, (300, n_latents), jnp.float32)
    label_big = textdecoder_forward(z_big, w_slab)
    jax.block_until_ready(label_big)
    label_big_ref = _reference_forward(z_big, params)
    assert label_big.shape == (300, 2)
    assert jnp.allclose(label_big, label_big_ref, atol=1e-4), "label mismatch (grid path)"

    print("KERNEL_OK")
</pallas_src>

<mosaic_0001>
module attributes {stable_mosaic.version = 11 : i64} {
  func.func @_textdecoder_kernel(%arg0: i32, %arg1: memref<8x8xf32, #tpu.memory_space<vmem>>, %arg2: memref<520x128xf32, #tpu.memory_space<vmem>>, %arg3: memref<8x8xf32, #tpu.memory_space<vmem>>) attributes {dimension_semantics = [#tpu.dimension_semantics<parallel>], iteration_bounds = array<i64: 1>, scalar_prefetch = 0 : i64, scratch_operands = 0 : i64, tpu.core_type = #tpu.core_type<tc>, window_params = [{transform_indices = @transform_0, window_bounds = array<i64: 8, 8>}, {pipeline_mode = #tpu.pipeline_mode<synchronous>, transform_indices = @transform_1, window_bounds = array<i64: 520, 128>}, {transform_indices = @transform_2, window_bounds = array<i64: 8, 8>}]} {
    %c0 = arith.constant 0 : index
    %c0_0 = arith.constant 0 : index
    %0 = vector.load %arg1[%c0, %c0_0] : memref<8x8xf32, #tpu.memory_space<vmem>>, vector<8x8xf32>
    %c0_1 = arith.constant 0 : index
    %c0_2 = arith.constant 0 : index
    %1 = vector.load %arg2[%c0_1, %c0_2] : memref<520x128xf32, #tpu.memory_space<vmem>>, vector<8x128xf32>
    %c512 = arith.constant 512 : index
    %c0_3 = arith.constant 0 : index
    %2 = vector.load %arg2[%c512, %c0_3] : memref<520x128xf32, #tpu.memory_space<vmem>>, vector<1x128xf32>
    %cst = arith.constant dense<0.000000e+00> : vector<8x128xf32>
    %3 = tpu.matmul %0, %1, %cst {dimension_numbers = #tpu.dot_dimension_numbers<[1], [0], [0], [1], [0, 0, 1, 1], [], []>} : vector<8x8xf32>, vector<8x128xf32>, vector<8x128xf32> -> vector<8x128xf32>
    %4 = vector.broadcast %2 : vector<1x128xf32> to vector<8x128xf32>
    %5 = arith.addf %3, %4 : vector<8x128xf32>
    %6 = arith.negf %5 : vector<8x128xf32>
    %7 = math.exp %6 : vector<8x128xf32>
    %cst_4 = arith.constant 1.000000e+00 : f32
    %8 = vector.broadcast %cst_4 : f32 to vector<8x128xf32>
    %9 = arith.addf %8, %7 : vector<8x128xf32>
    %10 = arith.divf %8, %9 : vector<8x128xf32>
    %11 = arith.mulf %5, %10 : vector<8x128xf32>
    %c128 = arith.constant 128 : index
    %c0_5 = arith.constant 0 : index
    %12 = vector.load %arg2[%c128, %c0_5] : memref<520x128xf32, #tpu.memory_space<vmem>>, vector<128x128xf32>
    %c513 = arith.constant 513 : index
    %c0_6 = arith.constant 0 : index
    %13 = vector.load %arg2[%c513, %c0_6] : memref<520x128xf32, #tpu.memory_space<vmem>>, vector<1x128xf32>
    %cst_7 = arith.constant dense<0.000000e+00> : vector<8x128xf32>
    %14 = tpu.matmul %11, %12, %cst_7 {dimension_numbers = #tpu.dot_dimension_numbers<[1], [0], [0], [1], [0, 0, 1, 1], [], []>} : vector<8x128xf32>, vector<128x128xf32>, vector<8x128xf32> -> vector<8x128xf32>
    %15 = vector.broadcast %13 : vector<1x128xf32> to vector<8x128xf32>
    %16 = arith.addf %14, %15 : vector<8x128xf32>
    %17 = arith.negf %16 : vector<8x128xf32>
    %18 = math.exp %17 : vector<8x128xf32>
    %cst_8 = arith.constant 1.000000e+00 : f32
    %19 = vector.broadcast %cst_8 : f32 to vector<8x128xf32>
    %20 = arith.addf %19, %18 : vector<8x128xf32>
    %21 = arith.divf %19, %20 : vector<8x128xf32>
    %22 = arith.mulf %16, %21 : vector<8x128xf32>
    %c256 = arith.constant 256 : index
    %c0_9 = arith.constant 0 : index
    %23 = vector.load %arg2[%c256, %c0_9] : memref<520x128xf32, #tpu.memory_space<vmem>>, vector<128x128xf32>
    %c514 = arith.constant 514 : index
    %c0_10 = arith.constant 0 : index
    %24 = vector.load %arg2[%c514, %c0_10] : memref<520x128xf32, #tpu.memory_space<vmem>>, vector<1x128xf32>
    %cst_11 = arith.constant dense<0.000000e+00> : vector<8x128xf32>
    %25 = tpu.matmul %22, %23, %cst_11 {dimension_numbers = #tpu.dot_dimension_numbers<[1], [0], [0], [1], [0, 0, 1, 1], [], []>} : vector<8x128xf32>, vector<128x128xf32>, vector<8x128xf32> -> vector<8x128xf32>
    %26 = vector.broadcast %24 : vector<1x128xf32> to vector<8x128xf32>
    %27 = arith.addf %25, %26 : vector<8x128xf32>
    %28 = arith.negf %27 : vector<8x128xf32>
    %29 = math.exp %28 : vector<8x128xf32>
    %cst_12 = arith.constant 1.000000e+00 : f32
    %30 = vector.broadcast %cst_12 : f32 to vector<8x128xf32>
    %31 = arith.addf %30, %29 : vector<8x128xf32>
    %32 = arith.divf %30, %31 : vector<8x128xf32>
    %33 = arith.mulf %27, %32 : vector<8x128xf32>
    %c384 = arith.constant 384 : index
    %c0_13 = arith.constant 0 : index
    %34 = vector.load %arg2[%c384, %c0_13] : memref<520x128xf32, #tpu.memory_space<vmem>>, vector<128x128xf32>
    %c515 = arith.constant 515 : index
    %c0_14 = arith.constant 0 : index
    %35 = vector.load %arg2[%c515, %c0_14] : memref<520x128xf32, #tpu.memory_space<vmem>>, vector<1x128xf32>
    %cst_15 = arith.constant dense<0.000000e+00> : vector<8x128xf32>
    %36 = tpu.matmul %33, %34, %cst_15 {dimension_numbers = #tpu.dot_dimension_numbers<[1], [0], [0], [1], [0, 0, 1, 1], [], []>} : vector<8x128xf32>, vector<128x128xf32>, vector<8x128xf32> -> vector<8x128xf32>
    %37 = vector.broadcast %35 : vector<1x128xf32> to vector<8x128xf32>
    %38 = arith.addf %36, %37 : vector<8x128xf32>
    %c516 = arith.constant 516 : index
    %c0_16 = arith.constant 0 : index
    %39 = vector.load %arg2[%c516, %c0_16] : memref<520x128xf32, #tpu.memory_space<vmem>>, vector<1x128xf32>
    %40 = math.sin %38 : vector<8x128xf32>
    %41 = vector.broadcast %39 : vector<1x128xf32> to vector<8x128xf32>
    %42 = arith.mulf %40, %41 : vector<8x128xf32>
    %43 = vector.extract_strided_slice %42 {offsets = [0, 0], sizes = [8, 8], strides = [1, 1]} : vector<8x128xf32> to vector<8x8xf32>
    %c0_17 = arith.constant 0 : index
    %c0_18 = arith.constant 0 : index
    %44 = vector.load %arg3[%c0_17, %c0_18] : memref<8x8xf32, #tpu.memory_space<vmem>>, vector<8x8xf32>
    tpu.vector_store %arg3[%c0_17, %c0_18], %43 {strides = array<i32>} : memref<8x8xf32, #tpu.memory_space<vmem>>, vector<8x8xf32>,
    return
  }
  func.func @transform_0(%arg0: i32) -> (i32, i32) {
    %c0_i32 = arith.constant 0 : i32
    %c0_i32_0 = arith.constant 0 : i32
    return %arg0, %c0_i32 : i32, i32
  }
  func.func @transform_1(%arg0: i32) -> (i32, i32) {
    %c0_i32 = arith.constant 0 : i32
    %c0_i32_0 = arith.constant 0 : i32
    %c0_i32_1 = arith.constant 0 : i32
    return %c0_i32, %c0_i32_0 : i32, i32
  }
  func.func @transform_2(%arg0: i32) -> (i32, i32) {
    %c0_i32 = arith.constant 0 : i32
    %c0_i32_0 = arith.constant 0 : i32
    return %arg0, %c0_i32 : i32, i32
  }
}

</mosaic_0001>

<bundles_post_ra>
// kernel: textdecoder_forward.1
= control target key start
LH: loop header
LB: loop body
LE: loop exit
PB: predicated region body
PF: predicated region fallthrough
CT: control target
= control target key end

     0   :  { %7 = vsyncpa [#allocation3], 0  ;;  %s588_s0 = inlined_call_operand.hbm [shape: f32[8,8], index: 0, kind: input, shape index: {}]   ;;  %s589_s1 = inlined_call_operand.hbm [shape: f32[520,128], index: 1, kind: input, shape index: {}]   ;;  %s590_s2 = inlined_call_operand.vmem [shape: f32[8,8], index: 2, kind: output, shape index: {}]  }
   0x1   :  { %s14_s11 = sshll.u32 %s588_s0, 4  ;;  %s15_s11 = int_to_ptr.hbm [resolvable:$true] %s14_s11 }
   0x2   :  { %8 = vsyncpa [#allocation5], 0  ;;  %s495_s12 = smov [#allocation2]   ;;  %s24_s16 = sshll.u32 %s589_s1, 4  ;;  %s25_s16 = int_to_ptr.hbm [resolvable:$true] %s24_s16 }
   0x3   :  { %s16_s13 = sshll.u32 %s495_s12, 4  ;;  %s496_s17 = smov [#allocation4]   ;;  %s17_s13 = int_to_ptr.vmem [resolvable:$true] %s16_s13 }
   0x4   :  { %19 = dma.hbm_to_vmem [thread:$0]  %s15_s11, 128, %s17_s13, [#allocation3]  }
   0x5   :  { %s26_s18 = sshll.u32 %s496_s17, 4  ;;  %s497_s19 = smov 128   ;;  %s27_s18 = int_to_ptr.vmem [resolvable:$true] %s26_s18 }
   0x6   :  { %s498_s20 = smov 8  }
   0x7   :  { %32 = dma.hbm_to_vmem [thread:$0]  %s25_s16, 8320, %s27_s18, [#allocation5], %s497_s19, %s497_s19, %s498_s20  }
   0x8   :  { %491 = dma.done.wait [#allocation3], 128  }
   0x9   :  { %492 = vsyncadd [#allocation3], 4294967168 }
   0xa   :  { %493 = dma.done.wait [#allocation5], 8320  }
   0xb   :  { %494 = vsyncadd [#allocation5], 4294958976  ;;  %vm45_vm0 = vcmask 64512   ;;  %v42_v0 = vld [vmem:[#allocation4] sm:$0xff]  ;;  %v41_v1 = vld [vmem:[#allocation2] sm:$0xff] }
   0xc   :  { %64 = vmatpush.msra.mxu0 %v42_v0  ;;  %v104_v2 = vld [vmem:[#allocation4 + $0xf8] sm:$0xff]  ;;  %v103_v3 = vld [vmem:[#allocation4 + $0xf0] sm:$0xff]  ;;  %v102_v4 = vld [vmem:[#allocation4 + $0xe8] sm:$0xff] }
   0xd   :  { %408 = vmatmul.msk.f32.vlgmr.msra.gmra.mxu0 %vm45_vm0, %v41_v1  ;;  %107 = vmatpush.msra.mxu1 %v104_v2  ;;  %v101_v5 = vld [vmem:[#allocation4 + $0xe0] sm:$0xff]  ;;  %v100_v6 = vld [vmem:[#allocation4 + $0xd8] sm:$0xff]  ;;  %v99_v7 = vld [vmem:[#allocation4 + $0xd0] sm:$0xff] }
   0xe   :  { %v98_v8 = vld [vmem:[#allocation4 + $0xc8] sm:$0xff]  ;;  %v97_v9 = vld [vmem:[#allocation4 + $0xc0] sm:$0xff]  ;;  %v96_v10 = vld [vmem:[#allocation4 + $0xb8] sm:$0xff] }
   0xf   :  { %108 = vmatpush.msra.mxu1 %v103_v3  ;;  %v95_v11 = vld [vmem:[#allocation4 + $0xb0] sm:$0xff]  ;;  %v94_v12 = vld [vmem:[#allocation4 + $0xa8] sm:$0xff]  ;;  %v93_v13 = vld [vmem:[#allocation4 + $0xa0] sm:$0xff] }
  0x10   :  { %v92_v14 = vld [vmem:[#allocation4 + $0x98] sm:$0xff]  ;;  %v91_v15 = vld [vmem:[#allocation4 + $0x90] sm:$0xff]  ;;  %v90_v16 = vld [vmem:[#allocation4 + $0x88] sm:$0xff] }
  0x11   :  { %109 = vmatpush.msra.mxu1 %v102_v4  ;;  %v426_v17 = vld [vmem:[#allocation4 + $0x200] ss:$0 sm:$0xff]  ;;  %v162_v35 = vld [vmem:[#allocation4 + $0x178] sm:$0xff]  ;;  %v161_v36 = vld [vmem:[#allocation4 + $0x170] sm:$0xff] }
  0x12   :  { %v89_v18 = vld [vmem:[#allocation4 + $0x80] sm:$0xff]  ;;  %165 = vmatpush.msra.mxu2 %v162_v35  ;;  %v160_v37 = vld [vmem:[#allocation4 + $0x168] sm:$0xff]  ;;  %v158_v39 = vld [vmem:[#allocation4 + $0x158] sm:$0xff] }
  0x13   :  { %110 = vmatpush.msra.mxu1 %v101_v5  ;;  %v159_v38 = vld [vmem:[#allocation4 + $0x160] sm:$0xff]  ;;  %v157_v40 = vld [vmem:[#allocation4 + $0x150] sm:$0xff]  ;;  %v156_v41 = vld [vmem:[#allocation4 + $0x148] sm:$0xff] }
  0x14   :  { %166 = vmatpush.msra.mxu2 %v161_v36  ;;  %v155_v42 = vld [vmem:[#allocation4 + $0x140] sm:$0xff]  ;;  %v154_v43 = vld [vmem:[#allocation4 + $0x138] sm:$0xff]  ;;  %v153_v44 = vld [vmem:[#allocation4 + $0x130] sm:$0xff] }
  0x15   :  { %111 = vmatpush.msra.mxu1 %v100_v6  ;;  %v152_v45 = vld [vmem:[#allocation4 + $0x128] sm:$0xff]  ;;  %v151_v46 = vld [vmem:[#allocation4 + $0x120] sm:$0xff]  ;;  %v150_v47 = vld [vmem:[#allocation4 + $0x118] sm:$0xff] }
  0x16   :  { %167 = vmatpush.msra.mxu2 %v160_v37  ;;  %v149_v48 = vld [vmem:[#allocation4 + $0x110] sm:$0xff]  ;;  %v148_v49 = vld [vmem:[#allocation4 + $0x108] sm:$0xff]  ;;  %v427_v50 = vld [vmem:[#allocation4 + $0x201] ss:$0 sm:$0xff] }
  0x17   :  { %112 = vmatpush.msra.mxu1 %v99_v7  ;;  %v147_v51 = vld [vmem:[#allocation4 + $0x100] sm:$0xff]  ;;  %v220_v4 = vld [vmem:[#allocation4 + $0x1f8] sm:$0xff]  ;;  %v219_v5 = vld [vmem:[#allocation4 + $0x1f0] sm:$0xff] }
  0x18   :  { %168 = vmatpush.msra.mxu2 %v159_v38  ;;  %223 = vmatpush.msra.mxu3 %v220_v4  ;;  %v218_v6 = vld [vmem:[#allocation4 + $0x1e8] sm:$0xff]  ;;  %v217_v7 = vld [vmem:[#allocation4 + $0x1e0] sm:$0xff] }
  0x19   :  { %113 = vmatpush.msra.mxu1 %v98_v8  ;;  %v216_v8 = vld [vmem:[#allocation4 + $0x1d8] sm:$0xff]  ;;  %v429_v37 = vld [vmem:[#allocation4 + $0x203] ss:$0 sm:$0xff] }
  0x1a   :  { %169 = vmatpush.msra.mxu2 %v158_v39  ;;  %224 = vmatpush.msra.mxu3 %v219_v5 }
  0x1b   :  { %114 = vmatpush.msra.mxu1 %v97_v9  ;;  %v215_v9 = vld [vmem:[#allocation4 + $0x1d0] sm:$0xff] }
  0x1c   :  { %170 = vmatpush.msra.mxu2 %v157_v40  ;;  %225 = vmatpush.msra.mxu3 %v218_v6 }
  0x1d   :  { %115 = vmatpush.msra.mxu1 %v96_v10  ;;  %v214_v10 = vld [vmem:[#allocation4 + $0x1c8] sm:$0xff] }
  0x1e   :  { %171 = vmatpush.msra.mxu2 %v156_v41  ;;  %226 = vmatpush.msra.mxu3 %v217_v7 }
  0x1f   :  { %116 = vmatpush.msra.mxu1 %v95_v11  ;;  %v213_v11 = vld [vmem:[#allocation4 + $0x1c0] sm:$0xff] }
  0x20   :  { %172 = vmatpush.msra.mxu2 %v155_v42  ;;  %227 = vmatpush.msra.mxu3 %v216_v8 }
  0x21   :  { %117 = vmatpush.msra.mxu1 %v94_v12  ;;  %v212_v12 = vld [vmem:[#allocation4 + $0x1b8] sm:$0xff] }
  0x22   :  { %173 = vmatpush.msra.mxu2 %v154_v43  ;;  %228 = vmatpush.msra.mxu3 %v215_v9 }
  0x23   :  { %118 = vmatpush.msra.mxu1 %v93_v13  ;;  %v211_v13 = vld [vmem:[#allocation4 + $0x1b0] sm:$0xff] }
  0x24   :  { %174 = vmatpush.msra.mxu2 %v153_v44  ;;  %229 = vmatpush.msra.mxu3 %v214_v10 }
  0x25   :  { %119 = vmatpush.msra.mxu1 %v92_v14  ;;  %v210_v14 = vld [vmem:[#allocation4 + $0x1a8] sm:$0xff] }
  0x26   :  { %175 = vmatpush.msra.mxu2 %v152_v45  ;;  %230 = vmatpush.msra.mxu3 %v213_v11 }
  0x27   :  { %120 = vmatpush.msra.mxu1 %v91_v15  ;;  %v209_v15 = vld [vmem:[#allocation4 + $0x1a0] sm:$0xff] }
  0x28   :  { %176 = vmatpush.msra.mxu2 %v151_v46  ;;  %231 = vmatpush.msra.mxu3 %v212_v12 }
  0x29   :  { %121 = vmatpush.msra.mxu1 %v90_v16  ;;  %v208_v16 = vld [vmem:[#allocation4 + $0x198] sm:$0xff] }
  0x2a   :  { %177 = vmatpush.msra.mxu2 %v150_v47  ;;  %232 = vmatpush.msra.mxu3 %v211_v13 }
  0x2b   :  { %122 = vmatpush.msra.mxu1 %v89_v18  ;;  %v206_v18 = vld [vmem:[#allocation4 + $0x188] sm:$0xff] }
  0x2c   :  { %178 = vmatpush.msra.mxu2 %v149_v48  ;;  %233 = vmatpush.msra.mxu3 %v210_v14 }
  0x2e   :  { %179 = vmatpush.msra.mxu2 %v148_v49  ;;  %234 = vmatpush.msra.mxu3 %v209_v15 }
  0x30   :  { %180 = vmatpush.msra.mxu2 %v147_v51  ;;  %235 = vmatpush.msra.mxu3 %v208_v16  ;;  %v499_v51 = vmov 683565275  }
  0x8a   :  { %v66_v19 = vpop.f32.mrf.mxu0 }
  0x8b   :  { %v67_v20 = vadd.f32 %v426_v17, %v66_v19  ;;  %v207_v17 = vld [vmem:[#allocation4 + $0x190] sm:$0xff]  ;;  %v428_v19 = vld [vmem:[#allocation4 + $0x202] ss:$0 sm:$0xff] }
  0x8c   :  { %236 = vmatpush.msra.mxu3 %v207_v17 }
  0x8d   :  { %v409_v21 = vmul.f32 -1.442695, %v67_v20 }
  0x8e   :  { %237 = vmatpush.msra.mxu3 %v206_v18 }
  0x8f   :  { %431 = vpow2.f32 %v409_v21 }
  0x95   :  { %v432_v22 = vpop.eup %431 }
  0x96   :  { %v72_v23 = vadd.f32 1.0, %v432_v22 }
  0x98   :  { %433 = vrcp.f32 %v72_v23  ;;  %v84_v27 = vand.u32 2147483648, %v72_v23  ;;  %v82_v29 = vand.u32 2147483647, %v72_v23  ;;  %vm78_vm2 = vweird.f32 %v72_v23 }
  0x9a   :  { %v85_v31 = vor.u32 1.1754944e-38, %v84_v27  ;;  %vm83_vm4 = vcmp.eq.f32.partialorder %v82_v29, 8.507059e+37 }
  0x9e   :  { %v434_v24 = vpop.eup %433 }
  0x9f   :  { %v74_v25 = vmul.f32 %v434_v24, %v72_v23  ;;  %vm79_vm1 = vweird.f32 %v434_v24 }
  0xa0   :  { %vm80_vm3 = vmor %vm78_vm2, %vm79_vm1 }
  0xa1   :  { %v75_v26 = vsub.f32 1.0, %v74_v25 }
  0xa3   :  { %v76_v28 = vmul.f32 %v434_v24, %v75_v26 }
  0xa5   :  { %v77_v30 = vadd.f32 %v434_v24, %v76_v28 }
  0xa7   :  { %v81_v32 = vsel %vm80_vm3, %v434_v24, %v77_v30 }
  0xa8   :  { %v86_v33 = vsel %vm83_vm4, %v85_v31, %v81_v32 }
  0xa9   :  { %v88_v34 = vmul.f32 %v86_v33, %v67_v20  ;;  %v205_v20 = vld [vmem:[#allocation4 + $0x180] sm:$0xff] }
  0xaa   :  { %238 = vmatpush.msra.mxu3 %v205_v20 }
  0xab   :  { %123 = vmatmul.f32.vlgmr.msra.gmra.mxu1 %v88_v34 }
 0x128   :  { %v124_v52 = vpop.f32.mrf.mxu1 }
 0x129   :  { %v125_v53 = vadd.f32 %v427_v50, %v124_v52 }
 0x12b   :  { %v410_v54 = vmul.f32 -1.442695, %v125_v53 }
 0x12d   :  { %435 = vpow2.f32 %v410_v54 }
 0x133   :  { %v436_v55 = vpop.eup %435 }
 0x134   :  { %v130_v56 = vadd.f32 1.0, %v436_v55 }
 0x136   :  { %437 = vrcp.f32 %v130_v56  ;;  %v142_v60 = vand.u32 2147483648, %v130_v56  ;;  %v140_v62 = vand.u32 2147483647, %v130_v56  ;;  %vm136_vm6 = vweird.f32 %v130_v56 }
 0x138   :  { %v143_v0 = vor.u32 1.1754944e-38, %v142_v60  ;;  %vm141_vm8 = vcmp.eq.f32.partialorder %v140_v62, 8.507059e+37  ;;  %v503_v62 = vmov 920167782  }
 0x13c   :  { %v438_v57 = vpop.eup %437 }
 0x13d   :  { %v132_v58 = vmul.f32 %v438_v57, %v130_v56  ;;  %vm137_vm5 = vweird.f32 %v438_v57  ;;  %v501_v56 = vmov 2131351028  }
 0x13e   :  { %vm138_vm7 = vmor %vm136_vm6, %vm137_vm5 }
 0x13f   :  { %v133_v59 = vsub.f32 1.0, %v132_v58 }
 0x141   :  { %v134_v61 = vmul.f32 %v438_v57, %v133_v59  ;;  %v502_v59 = vmov 2102212464  }
 0x143   :  { %v135_v63 = vadd.f32 %v438_v57, %v134_v61 }
 0x145   :  { %v139_v1 = vsel %vm138_vm7, %v438_v57, %v135_v63 }
 0x146   :  { %v144_v2 = vsel %vm141_vm8, %v143_v0, %v139_v1  ;;  %v504_v1 = vmov 1326507024  }
 0x147   :  { %v146_v3 = vmul.f32 %v144_v2, %v125_v53  ;;  %v500_v53 = vmov 2475754826  }
 0x149   :  { %181 = vmatmul.f32.vlgmr.msra.gmra.mxu2 %v146_v3 }
 0x1cc   :  { %v182_v21 = vpop.f32.mrf.mxu2 }
 0x1cd   :  { %v183_v22 = vadd.f32 %v428_v19, %v182_v21 }
 0x1cf   :  { %v411_v23 = vmul.f32 -1.442695, %v183_v22 }
 0x1d1   :  { %439 = vpow2.f32 %v411_v23 }
 0x1d7   :  { %v440_v24 = vpop.eup %439 }
 0x1d8   :  { %v188_v25 = vadd.f32 1.0, %v440_v24 }
 0x1da   :  { %441 = vrcp.f32 %v188_v25  ;;  %v200_v29 = vand.u32 2147483648, %v188_v25  ;;  %v198_v31 = vand.u32 2147483647, %v188_v25  ;;  %vm194_vm10 = vweird.f32 %v188_v25 }
 0x1dc   :  { %v201_v33 = vor.u32 1.1754944e-38, %v200_v29  ;;  %vm199_vm12 = vcmp.eq.f32.partialorder %v198_v31, 8.507059e+37 }
 0x1e0   :  { %v442_v26 = vpop.eup %441 }
 0x1e1   :  { %v190_v27 = vmul.f32 %v442_v26, %v188_v25  ;;  %vm195_vm9 = vweird.f32 %v442_v26 }
 0x1e2   :  { %vm196_vm11 = vmor %vm194_vm10, %vm195_vm9 }
 0x1e3   :  { %v191_v28 = vsub.f32 1.0, %v190_v27 }
 0x1e5   :  { %v192_v30 = vmul.f32 %v442_v26, %v191_v28 }
 0x1e7   :  { %v193_v32 = vadd.f32 %v442_v26, %v192_v30 }
 0x1e9   :  { %v197_v34 = vsel %vm196_vm11, %v442_v26, %v193_v32 }
 0x1ea   :  { %v202_v35 = vsel %vm199_vm12, %v201_v33, %v197_v34 }
 0x1eb   :  { %v204_v36 = vmul.f32 %v202_v35, %v183_v22  ;;  %v505_v35 = vmov 0  }
 0x1ed   :  { %239 = vmatmul.f32.vlgmr.msra.gmra.mxu3 %v204_v36 }
 0x270   :  { %v240_v38 = vpop.f32.mrf.mxu3 }
 0x271   :  { %v528_v39 = vadd.f32 %v429_v37, %v240_v38 }
 0x273   :  { %v247_v40 = vand.u32 2139095040, %v528_v39  ;;  %v244_v43 = vand.u32 2147483647, %v528_v39  ;;  %vm246_vm10 = vcmp.lt.s32.totalorder %v528_v39, 0 }
 0x275   :  { %v248_v41 = vshrl.u32 %v247_v40, 23  ;;  %v251_v45 = vand.u32 8388607, %v244_v43  ;;  %vm245_vm11 = vcmp.le.f32.partialorder %v244_v43, 0.7853982 }
 0x277   :  { %v412_v42 = vadd.s32 4294967169, %v248_v41  ;;  %v252_v49 = vor.u32 8388608, %v251_v45 }
 0x279   :  { %v254_v44 = vadd.s32 1, %v412_v42  ;;  %v545_v8 = vshll.u32 %v252_v49, 8 }
 0x27b   :  { %vm255_vm13 = vcmp.gt.s32.totalorder %v254_v44, 0  ;;  %v293_v17 = vand.u32 65535, %v545_v8  ;;  %v294_v18 = vshrl.u32 %v545_v8, 16 }
 0x27c   :  { %v256_v46 = vsel %vm255_vm13, %v254_v44, 0 }
 0x27d   :  { %v258_v47 = vand.u32 31, %v256_v46  ;;  %v536_v50 = vshrl.u32 %v256_v46, 5 }
 0x27f   :  { %v534_v48 = vsub.s32 32, %v258_v47  ;;  %v261_v52 = vshll.u32 %v499_v51, %v258_v47  ;;  %v264_v54 = vshll.u32 %v500_v53, %v258_v47  ;;  %v267_v58 = vshll.u32 %v501_v56, %v258_v47 }
 0x280   :  { %v270_v61 = vshll.u32 %v502_v59, %v258_v47  ;;  %v273_v0 = vshll.u32 %v503_v62, %v258_v47  ;;  %vm276_vm14 = vcmp.lt.s32.totalorder %v536_v50, 1  ;;  %vm279_vm15 = vcmp.lt.s32.totalorder %v536_v50, 4 }
 0x281   :  { %v262_v55 = vshrl.u32 %v500_v53, %v534_v48  ;;  %v265_v57 = vshrl.u32 %v501_v56, %v534_v48  ;;  %v268_v60 = vshrl.u32 %v502_v59, %v534_v48  ;;  %v271_v63 = vshrl.u32 %v503_v62, %v534_v48 }
 0x282   :  { %v274_v2 = vshrl.u32 %v504_v1, %v534_v48  ;;  %vm278_vm1 = vcmp.lt.s32.totalorder %v536_v50, 3  ;;  %vm277_vm2 = vcmp.lt.s32.totalorder %v536_v50, 2  ;;  %v260_v46 = vshrl.u32 %v499_v51, %v534_v48 }
 0x283   :  { %v263_v3 = vor.u32 %v262_v55, %v261_v52  ;;  %v266_v4 = vor.u32 %v265_v57, %v264_v54  ;;  %v269_v5 = vor.u32 %v268_v60, %v267_v58  ;;  %v272_v6 = vor.u32 %v271_v63, %v270_v61 }
 0x284   :  { %v275_v7 = vor.u32 %v274_v2, %v273_v0 }
 0x285   :  { %v284_v9 = vsel %vm276_vm14, %v263_v3, %v266_v4  ;;  %v288_v10 = vsel %vm276_vm14, %v266_v4, %v269_v5  ;;  %v285_v11 = vsel %vm279_vm15, %v272_v6, 920167782  ;;  %v281_v42 = vsel %vm279_vm15, %v269_v5, 2102212464 }
 0x286   :  { %v289_v12 = vsel %vm279_vm15, %v275_v7, 1326507024  ;;  %v286_v13 = vsel %vm278_vm1, %v269_v5, %v285_v11  ;;  %v280_v55 = vsel %vm276_vm14, %v260_v46, %v263_v3  ;;  %v282_v56 = vsel %vm278_vm1, %v266_v4, %v281_v42 }
 0x287   :  { %v290_v14 = vsel %vm278_vm1, %v272_v6, %v289_v12  ;;  %v287_v15 = vsel %vm277_vm2, %v284_v9, %v286_v13  ;;  %v283_v48 = vsel %vm277_vm2, %v280_v55, %v282_v56  ;;  %vm387_vm15 = vweird.f32 %v528_v39 }
 0x288   :  { %v291_v16 = vsel %vm277_vm2, %v288_v10, %v290_v14  ;;  %v317_v21 = vand.u32 65535, %v287_v15  ;;  %v318_v22 = vshrl.u32 %v287_v15, 16  ;;  %v337_v0 = vmul.u32 %v545_v8, %v283_v48 }
 0x289   :  { %v295_v19 = vand.u32 65535, %v291_v16  ;;  %v296_v20 = vshrl.u32 %v291_v16, 16 }
 0x28a   :  { %v320_v25 = vmul.u32 %v318_v22, %v293_v17  ;;  %v321_v26 = vmul.u32 %v317_v21, %v294_v18  ;;  %v319_v30 = vmul.u32 %v317_v21, %v293_v17  ;;  %v322_v34 = vmul.u32 %v318_v22, %v294_v18 }
 0x28b   :  { %v298_v23 = vmul.u32 %v296_v20, %v293_v17  ;;  %v299_v24 = vmul.u32 %v295_v19, %v294_v18  ;;  %v297_v27 = vmul.u32 %v295_v19, %v293_v17  ;;  %v300_v29 = vmul.u32 %v296_v20, %v294_v18 }
 0x28c   :  { %v323_v31 = vshll.u32 %v320_v25, 16  ;;  %v325_v37 = vshll.u32 %v321_v26, 16  ;;  %v324_v53 = vshrl.u32 %v320_v25, 16  ;;  %v326_v59 = vshrl.u32 %v321_v26, 16 }
 0x28d   :  { %v301_v28 = vshll.u32 %v298_v23, 16  ;;  %v303_v32 = vshll.u32 %v299_v24, 16  ;;  %v302_v47 = vshrl.u32 %v298_v23, 16  ;;  %v304_v57 = vshrl.u32 %v299_v24, 16 }
 0x28e   :  { %vm327_vm4 = vc.u32 %v319_v30, %v323_v31  ;;  %v329_v38 = vadd.s32 %v323_v31, %v319_v30 }
 0x28f   :  { %vm305_vm3 = vc.u32 %v297_v27, %v301_v28  ;;  %v307_v33 = vadd.s32 %v301_v28, %v297_v27  ;;  %v328_v41 = vsel %vm327_vm4, 1, %v505_v35 }
 0x290   :  { %v306_v36 = vsel %vm305_vm3, 1, %v505_v35  ;;  %v330_v45 = vadd.s32 %v328_v41, %v322_v34  ;;  %vm331_vm6 = vc.u32 %v329_v38, %v325_v37  ;;  %v333_v62 = vadd.s32 %v329_v38, %v325_v37 }
 0x291   :  { %v308_v40 = vadd.s32 %v306_v36, %v300_v29  ;;  %vm309_vm5 = vc.u32 %v307_v33, %v303_v32  ;;  %v332_v52 = vsel %vm331_vm6, 1, %v505_v35 }
 0x292   :  { %v310_v44 = vsel %vm309_vm5, 1, %v505_v35  ;;  %v334_v54 = vadd.s32 %v332_v52, %v330_v45 }
 0x293   :  { %v312_v49 = vadd.s32 %v310_v44, %v308_v40 }
 0x294   :  { %v335_v60 = vadd.s32 %v334_v54, %v324_v53 }
 0x295   :  { %v313_v58 = vadd.s32 %v312_v49, %v302_v47  ;;  %v430_v49 = vld [vmem:[#allocation4 + $0x204] ss:$0 sm:$0xff] }
 0x296   :  { %v336_v51 = vadd.s32 %v335_v60, %v326_v59 }
 0x297   :  { %v314_v61 = vadd.s32 %v313_v58, %v304_v57 }
 0x298   :  { %v340_v63 = vadd.s32 1, %v336_v51 }
 0x299   :  { %vm339_vm7 = vc.u32 %v314_v61, %v333_v62  ;;  %v338_v50 = vadd.s32 %v333_v62, %v314_v61 }
 0x29a   :  { %v341_v1 = vsel %vm339_vm7, %v340_v63, %v336_v51 }
 0x29b   :  { %v342_v2 = vadd.s32 %v341_v1, %v337_v0 }
 0x29d   :  { %v343_v3 = vadd.s32 536870912, %v342_v2 }
 0x29f   :  { %v344_v5 = vshrl.u32 %v343_v3, 30 }
 0x2a1   :  { %v345_v6 = vshll.u32 %v344_v5, 30  ;;  %v368_v25 = vsub.s32 4, %v344_v5 }
 0x2a3   :  { %v346_v4 = vsub.s32 %v342_v2, %v345_v6  ;;  %v369_v30 = vsel %vm246_vm10, %v368_v25, %v344_v5 }
 0x2a4   :  { %v371_v33 = vsel %vm245_vm11, 0, %v369_v30 }
 0x2a5   :  { %vm347_vm8 = vcmp.lt.s32.totalorder %v346_v4, 0  ;;  %v348_v7 = vsub.s32 0, %v346_v4  ;;  %v388_v38 = vadd.s32 3, %v371_v33 }
 0x2a7   :  { %v349_v9 = vsel %vm347_vm8, %v348_v7, %v346_v4  ;;  %v389_v44 = vand.u32 3, %v388_v38 }
 0x2a8   :  { %v350_v10 = vclz %v349_v9 }
 0x2a9   :  { %vm391_vm12 = vcmp.eq.s32.totalorder %v389_v44, 0  ;;  %vm394_vm13 = vcmp.eq.s32.totalorder %v389_v44, 2  ;;  %vm390_vm14 = vcmp.lt.s32.totalorder %v389_v44, 2 }
 0x2aa   :  { %v413_v11 = vadd.s32 4294967294, %v350_v10 }
 0x2ac   :  { %vm414_vm9 = vcmp.lt.s32.totalorder %v413_v11, 0 }
 0x2ad   :  { %v353_v12 = vsel %vm414_vm9, 0, %v413_v11 }
 0x2ae   :  { %v354_v13 = vsub.s32 32, %v353_v12  ;;  %v358_v14 = vsub.s32 4294967266, %v353_v12  ;;  %v355_v15 = vshll.u32 %v346_v4, %v353_v12 }
 0x2b0   :  { %v356_v16 = vshrl.u32 %v338_v50, %v354_v13  ;;  %v359_v17 = vadd.s32 127, %v358_v14 }
 0x2b2   :  { %v357_v8 = vor.u32 %v356_v16, %v355_v15  ;;  %v360_v18 = vshll.u32 %v359_v17, 23 }
 0x2b4   :  { %v361_v19 = vor.u32 4788187, %v360_v18  ;;  %v364_v21 = vcvt.s32.f32 %v357_v8 }
 0x2b6   :  { %v362_v20 = vand.u32 2147483647, %v361_v19 }
 0x2b8   :  { %v365_v22 = vmul.f32 %v364_v21, %v362_v20 }
 0x2ba   :  { %v366_v23 = vxor.u32 2147483648, %v365_v22 }
 0x2bc   :  { %v367_v24 = vsel %vm246_vm10, %v366_v23, %v365_v22 }
 0x2bd   :  { %v370_v26 = vsel %vm245_vm11, %v528_v39, %v367_v24 }
 0x2be   :  { %v372_v27 = vmul.f32 %v370_v26, %v370_v26 }
 0x2c0   :  { %v373_v28 = vmul.f32 -0.001358992, %v372_v27  ;;  %v380_v29 = vmul.f32 -0.00019511016, %v372_v27 }
 0x2c2   :  { %v374_v31 = vadd.f32 0.041655596, %v373_v28  ;;  %v381_v32 = vadd.f32 0.008332121, %v380_v29 }
 0x2c4   :  { %v375_v34 = vmul.f32 %v374_v31, %v372_v27  ;;  %v382_v35 = vmul.f32 %v381_v32, %v372_v27 }
 0x2c6   :  { %v376_v36 = vadd.f32 -0.4999988, %v375_v34  ;;  %v383_v37 = vadd.f32 -0.16666654, %v382_v35 }
 0x2c8   :  { %v377_v40 = vmul.f32 %v376_v36, %v372_v27  ;;  %v384_v41 = vmul.f32 %v383_v37, %v372_v27 }
 0x2ca   :  { %v378_v42 = vadd.f32 1.0, %v377_v40  ;;  %v385_v43 = vadd.f32 1.0, %v384_v41 }
 0x2cc   :  { %v386_v45 = vmul.f32 %v385_v43, %v370_v26  ;;  %v395_v46 = vxor.u32 2147483648, %v378_v42 }
 0x2ce   :  { %v392_v47 = vxor.u32 2147483648, %v386_v45  ;;  %v396_v53 = vsel %vm394_vm13, %v395_v46, %v386_v45 }
 0x2d0   :  { %v393_v52 = vsel %vm391_vm12, %v378_v42, %v392_v47 }
 0x2d1   :  { %v397_v54 = vsel %vm390_vm14, %v393_v52, %v396_v53 }
 0x2d2   :  { %v398_v55 = vsel %vm387_vm15, nan, %v397_v54 }
 0x2d3   :  { %v400_v56 = vmul.f32 %v430_v49, %v398_v55 }
 0x2d5   :  { %401 = vst.msk [vmem:[%s590_s2] sm:$0xff] %vm45_vm0, %v400_v56 }
 0x2d6   :  { %406 = vsyncpa [#allocation3], 1 }
 0x2d7   :  { %407 = vsyncpa [#allocation5], 1 }

</bundles_post_ra>
